<compile_context>
chip_gen: v7x
topology: tpu7x:2x2x1
jax: 0.10.0
libtpu: 0.0.40
codegen_flags: <defaults>
</compile_context>

<pallas_src>
import functools

import jax
import jax.numpy as jnp
from jax.experimental import pallas as pl
from jax.experimental.pallas import tpu as pltpu


# ---------------------------------------------------------------------------
# Fused path: pool + excite + rescale in one pass (per batch element).
# ---------------------------------------------------------------------------
def _fused_cse_kernel(x_ref, w1t_ref, w2t_ref, o_ref, *, inv_hw):
    # x_ref : [1, C, HW]   w1t_ref : [C, Cr]   w2t_ref : [Cr, C]
    # o_ref : [1, C, HW]
    x = x_ref[...]
    pooled = jnp.sum(x, axis=-1, dtype=jnp.float32) * inv_hw              # [1, C]
    h = jnp.dot(pooled, w1t_ref[...], preferred_element_type=jnp.float32)
    h = jnp.maximum(h, 0.0)                                               # [1, Cr]
    s = jnp.dot(h, w2t_ref[...], preferred_element_type=jnp.float32)
    s = jax.nn.sigmoid(s)                                                 # [1, C]
    o_ref[...] = x * s[:, :, None].astype(o_ref.dtype)


# ---------------------------------------------------------------------------
# Streaming path, phase 1: global average pool (accumulated over HW tiles)
# followed by squeeze/excite in the last-tile epilogue.
# ---------------------------------------------------------------------------
def _pool_excite_kernel(x_ref, w1t_ref, w2t_ref, s_ref, acc_ref, *, inv_hw):
    # x_ref : [1, C, T]   w1t_ref : [C, Cr]   w2t_ref : [Cr, C]
    # s_ref : [1, C, 1]   acc_ref : [1, C] f32 scratch (persists across tiles)
    t = pl.program_id(1)

    @pl.when(t == 0)
    def _init():
        acc_ref[...] = jnp.zeros_like(acc_ref)

    # Accumulate per-(b, c) sums in f32 without materializing an f32 copy of x.
    acc_ref[...] += jnp.sum(x_ref[...], axis=-1, dtype=jnp.float32)       # [1, C]

    @pl.when(t == pl.num_programs(1) - 1)
    def _finalize():
        pooled = acc_ref[...] * inv_hw                                    # [1, C]
        h = jnp.dot(pooled, w1t_ref[...], preferred_element_type=jnp.float32)
        h = jnp.maximum(h, 0.0)                                           # [1, Cr]
        s = jnp.dot(h, w2t_ref[...], preferred_element_type=jnp.float32)
        s = jax.nn.sigmoid(s)                                             # [1, C]
        s_ref[...] = s[:, :, None]                                        # [1, C, 1]


# ---------------------------------------------------------------------------
# Streaming path, phase 2: broadcast channel re-scale, out = x * s.
# ---------------------------------------------------------------------------
def _scale_kernel(x_ref, s_ref, o_ref):
    # x_ref : [1, C, T]   s_ref : [1, C, 1] f32   o_ref : [1, C, T]
    o_ref[...] = x_ref[...] * s_ref[...].astype(o_ref.dtype)


# ---------------------------------------------------------------------------
# Tiling / VMEM helpers.
# ---------------------------------------------------------------------------
def _pick_hw_tile(hw, c, itemsize, max_tile_bytes):
    """Largest multiple-of-128 divisor of hw whose [C, T] slab fits the cap."""
    if hw % 128 != 0:
        return hw  # odd spatial extent: single full-width block (allowed)
    best = 0
    t = 128
    while t <= hw:
        if hw % t == 0 and c * t * itemsize <= max_tile_bytes:
            best = t
        t += 128
    return best if best > 0 else 128


def _vmem_limit_bytes(*per_buffer_bytes):
    # Each pipelined buffer is double-buffered; add headroom for scratch,
    # weights and semaphores. Clamp well below v7x's 64 MiB physical VMEM.
    need = 2 * sum(per_buffer_bytes) + (2 << 20)
    return int(min(max(need, 8 << 20), 48 << 20))


# ---------------------------------------------------------------------------
# Wrapper: full CSE_Block forward.
# ---------------------------------------------------------------------------
def cse_block(x_nchw, w1, w2, *, donate_x=False,
              max_fused_bytes=8 << 20, max_tile_bytes=4 << 20):
    """Forward of CSE_Block.

    x_nchw : [B, C, H, W]
    w1     : [C//r, C, 1, 1]  (PyTorch Conv2d weight, bias=False)
    w2     : [C, C//r, 1, 1]
    """
    B, C, H, W = x_nchw.shape
    Cr = w1.shape[0]
    HW = H * W

    x_flat = x_nchw.reshape(B, C, HW)
    # Pre-transpose the (tiny, static) conv weights in the wrapper so the
    # kernel never pays an in-kernel transpose: pooled @ w1t, h @ w2t.
    w1t = jnp.transpose(w1.reshape(Cr, C)).astype(jnp.float32)   # [C, Cr]
    w2t = jnp.transpose(w2.reshape(C, Cr)).astype(jnp.float32)   # [Cr, C]

    itemsize = jnp.dtype(x_nchw.dtype).itemsize
    slab_bytes = C * HW * itemsize
    alias = {0: 0} if donate_x else {}

    # ---- Fused single-pass path: one read + one write of x ------------------
    if slab_bytes <= max_fused_bytes:
        out_flat = pl.pallas_call(
            functools.partial(_fused_cse_kernel, inv_hw=1.0 / float(HW)),
            out_shape=jax.ShapeDtypeStruct((B, C, HW), x_nchw.dtype),
            grid_spec=pltpu.PrefetchScalarGridSpec(
                num_scalar_prefetch=0,
                grid=(B,),
                in_specs=[
                    pl.BlockSpec((1, C, HW), lambda b: (b, 0, 0)),
                    pl.BlockSpec((C, Cr), lambda b: (0, 0)),
                    pl.BlockSpec((Cr, C), lambda b: (0, 0)),
                ],
                out_specs=pl.BlockSpec((1, C, HW), lambda b: (b, 0, 0)),
            ),
            compiler_params=pltpu.CompilerParams(
                dimension_semantics=("parallel",),
                vmem_limit_bytes=_vmem_limit_bytes(slab_bytes, slab_bytes),
            ),
            input_output_aliases=alias,
        )(x_flat, w1t, w2t)
        return out_flat.reshape(B, C, H, W)

    # ---- Streaming two-pass path --------------------------------------------
    T = _pick_hw_tile(HW, C, itemsize, max_tile_bytes)
    n_t = HW // T
    x_tile_bytes = C * T * itemsize

    # Phase 1: pooled channel means -> s = sigmoid(W2 relu(W1 pooled))
    s = pl.pallas_call(
        functools.partial(_pool_excite_kernel, inv_hw=1.0 / float(HW)),
        out_shape=jax.ShapeDtypeStruct((B, C, 1), jnp.float32),
        grid_spec=pltpu.PrefetchScalarGridSpec(
            num_scalar_prefetch=0,
            grid=(B, n_t),
            in_specs=[
                pl.BlockSpec((1, C, T), lambda b, t: (b, 0, t)),
                pl.BlockSpec((C, Cr), lambda b, t: (0, 0)),
                pl.BlockSpec((Cr, C), lambda b, t: (0, 0)),
            ],
            out_specs=pl.BlockSpec((1, C, 1), lambda b, t: (b, 0, 0)),
            scratch_shapes=[pltpu.VMEM((1, C), jnp.float32)],
        ),
        compiler_params=pltpu.CompilerParams(
            dimension_semantics=("parallel", "arbitrary"),
            vmem_limit_bytes=_vmem_limit_bytes(x_tile_bytes),
        ),
    )(x_flat, w1t, w2t)                                            # [B, C, 1]

    # Phase 2: out = x * s, streamed and fully parallel
    out_flat = pl.pallas_call(
        _scale_kernel,
        out_shape=jax.ShapeDtypeStruct((B, C, HW), x_nchw.dtype),
        grid_spec=pltpu.PrefetchScalarGridSpec(
            num_scalar_prefetch=0,
            grid=(B, n_t),
            in_specs=[
                pl.BlockSpec((1, C, T), lambda b, t: (b, 0, t)),
                pl.BlockSpec((1, C, 1), lambda b, t: (b, 0, 0)),
            ],
            out_specs=pl.BlockSpec((1, C, T), lambda b, t: (b, 0, t)),
        ),
        compiler_params=pltpu.CompilerParams(
            dimension_semantics=("parallel", "parallel"),
            vmem_limit_bytes=_vmem_limit_bytes(x_tile_bytes, x_tile_bytes),
        ),
        input_output_aliases=alias,
    )(x_flat, s)

    return out_flat.reshape(B, C, H, W)


def _reference(x, w1, w2):
    # Pure-JAX reference of the PyTorch forward, for a sanity check.
    B, C, H, W = x.shape
    Cr = w1.shape[0]
    pooled = jnp.mean(x, axis=(2, 3))                       # [B, C]
    h = jnp.maximum(pooled @ w1.reshape(Cr, C).T, 0.0)      # [B, Cr]
    s = jax.nn.sigmoid(h @ w2.reshape(C, Cr).T)             # [B, C]
    return x * s[:, :, None, None]


if __name__ == "__main__":
    # Small shapes consistent with the module: inplanes=8, reduce_ratio=4.
    B, C, H, W = 2, 8, 16, 16
    reduce_ratio = 4
    Cr = C // reduce_ratio

    key = jax.random.PRNGKey(0)
    kx, k1, k2 = jax.random.split(key, 3)
    x = jax.random.normal(kx, (B, C, H, W), dtype=jnp.float32)
    # Deterministic synthetic parameters (Conv2d weights, bias=False).
    w1 = jax.random.normal(k1, (Cr, C, 1, 1), dtype=jnp.float32) * 0.1
    w2 = jax.random.normal(k2, (C, Cr, 1, 1), dtype=jnp.float32) * 0.1

    ref = _reference(x, w1, w2)

    # 1) Default: fused single-pass path (per-batch slab easily fits VMEM).
    out = jax.block_until_ready(cse_block(x, w1, w2))
    assert out.shape == (B, C, H, W)
    assert jnp.allclose(out, ref, atol=1e-5, rtol=1e-5), "fused mismatch"

    # 2) Force the streaming two-pass path (single full-width HW tile).
    out_stream = jax.block_until_ready(cse_block(x, w1, w2, max_fused_bytes=0))
    assert jnp.allclose(out_stream, ref, atol=1e-5, rtol=1e-5), "stream mismatch"

    # 3) Force multiple HW tiles to exercise the gridded pooling accumulator.
    out_tiled = jax.block_until_ready(
        cse_block(x, w1, w2, max_fused_bytes=0, max_tile_bytes=4096))
    assert jnp.allclose(out_tiled, ref, atol=1e-5, rtol=1e-5), "tiled mismatch"

    print("KERNEL_OK")
</pallas_src>

<mosaic_0001>
module attributes {stable_mosaic.version = 11 : i64} {
  func.func @_fused_cse_kernel(%arg0: i32, %arg1: memref<1x8x256xf32, #tpu.memory_space<vmem>>, %arg2: memref<8x2xf32, #tpu.memory_space<vmem>>, %arg3: memref<2x8xf32, #tpu.memory_space<vmem>>, %arg4: memref<1x8x256xf32, #tpu.memory_space<vmem>>) attributes {dimension_semantics = [#tpu.dimension_semantics<parallel>], iteration_bounds = array<i64: 2>, scalar_prefetch = 0 : i64, scratch_operands = 0 : i64, tpu.core_type = #tpu.core_type<tc>, window_params = [{transform_indices = @transform_0, window_bounds = array<i64: 1, 8, 256>}, {pipeline_mode = #tpu.pipeline_mode<synchronous>, transform_indices = @transform_1, window_bounds = array<i64: 8, 2>}, {pipeline_mode = #tpu.pipeline_mode<synchronous>, transform_indices = @transform_2, window_bounds = array<i64: 2, 8>}, {transform_indices = @transform_3, window_bounds = array<i64: 1, 8, 256>}]} {
    %c0 = arith.constant 0 : index
    %c0_0 = arith.constant 0 : index
    %c0_1 = arith.constant 0 : index
    %0 = vector.load %arg1[%c0, %c0_0, %c0_1] : memref<1x8x256xf32, #tpu.memory_space<vmem>>, vector<1x8x256xf32>
    %cst = arith.constant dense<0.000000e+00> : vector<1x8xf32>
    %1 = vector.multi_reduction <add>, %0, %cst [2] : vector<1x8x256xf32> to vector<1x8xf32>
    %cst_2 = arith.constant 3.906250e-03 : f32
    %2 = vector.broadcast %cst_2 : f32 to vector<1x8xf32>
    %3 = arith.mulf %1, %2 : vector<1x8xf32>
    %c0_3 = arith.constant 0 : index
    %c0_4 = arith.constant 0 : index
    %4 = vector.load %arg2[%c0_3, %c0_4] : memref<8x2xf32, #tpu.memory_space<vmem>>, vector<8x2xf32>
    %cst_5 = arith.constant dense<0.000000e+00> : vector<1x2xf32>
    %5 = tpu.matmul %3, %4, %cst_5 {dimension_numbers = #tpu.dot_dimension_numbers<[1], [0], [0], [1], [0, 0, 1, 1], [], []>} : vector<1x8xf32>, vector<8x2xf32>, vector<1x2xf32> -> vector<1x2xf32>
    %cst_6 = arith.constant 0.000000e+00 : f32
    %6 = vector.broadcast %cst_6 : f32 to vector<1x2xf32>
    %7 = arith.maximumf %5, %6 : vector<1x2xf32>
    %c0_7 = arith.constant 0 : index
    %c0_8 = arith.constant 0 : index
    %8 = vector.load %arg3[%c0_7, %c0_8] : memref<2x8xf32, #tpu.memory_space<vmem>>, vector<2x8xf32>
    %cst_9 = arith.constant dense<0.000000e+00> : vector<1x8xf32>
    %9 = tpu.matmul %7, %8, %cst_9 {dimension_numbers = #tpu.dot_dimension_numbers<[1], [0], [0], [1], [0, 0, 1, 1], [], []>} : vector<1x2xf32>, vector<2x8xf32>, vector<1x8xf32> -> vector<1x8xf32>
    %10 = arith.negf %9 : vector<1x8xf32>
    %11 = math.exp %10 : vector<1x8xf32>
    %cst_10 = arith.constant 1.000000e+00 : f32
    %12 = vector.broadcast %cst_10 : f32 to vector<1x8xf32>
    %13 = arith.addf %12, %11 : vector<1x8xf32>
    %14 = arith.divf %12, %13 : vector<1x8xf32>
    %15 = vector.shape_cast %14 : vector<1x8xf32> to vector<1x8x1xf32>
    %16 = vector.broadcast %15 : vector<1x8x1xf32> to vector<1x8x256xf32>
    %17 = arith.mulf %0, %16 : vector<1x8x256xf32>
    %c0_11 = arith.constant 0 : index
    %c0_12 = arith.constant 0 : index
    %c0_13 = arith.constant 0 : index
    %18 = vector.load %arg4[%c0_11, %c0_12, %c0_13] : memref<1x8x256xf32, #tpu.memory_space<vmem>>, vector<1x8x256xf32>
    tpu.vector_store %arg4[%c0_11, %c0_12, %c0_13], %17 {strides = array<i32>} : memref<1x8x256xf32, #tpu.memory_space<vmem>>, vector<1x8x256xf32>,
    return
  }
  func.func @transform_0(%arg0: i32) -> (i32, i32, i32) {
    %c0_i32 = arith.constant 0 : i32
    %c0_i32_0 = arith.constant 0 : i32
    %c0_i32_1 = arith.constant 0 : i32
    return %arg0, %c0_i32, %c0_i32_0 : i32, i32, i32
  }
  func.func @transform_1(%arg0: i32) -> (i32, i32) {
    %c0_i32 = arith.constant 0 : i32
    %c0_i32_0 = arith.constant 0 : i32
    %c0_i32_1 = arith.constant 0 : i32
    return %c0_i32, %c0_i32_0 : i32, i32
  }
  func.func @transform_2(%arg0: i32) -> (i32, i32) {
    %c0_i32 = arith.constant 0 : i32
    %c0_i32_0 = arith.constant 0 : i32
    %c0_i32_1 = arith.constant 0 : i32
    return %c0_i32, %c0_i32_0 : i32, i32
  }
  func.func @transform_3(%arg0: i32) -> (i32, i32, i32) {
    %c0_i32 = arith.constant 0 : i32
    %c0_i32_0 = arith.constant 0 : i32
    %c0_i32_1 = arith.constant 0 : i32
    return %arg0, %c0_i32, %c0_i32_0 : i32, i32, i32
  }
}

</mosaic_0001>

<bundles_post_ra>
// kernel: tpu_custom_call.1
= control target key start
LH: loop header
LB: loop body
LE: loop exit
PB: predicated region body
PF: predicated region fallthrough
CT: control target
= control target key end

     0   :  { %8 = vsyncpa [#allocation3], 0  ;;  %s835_s0 = inlined_call_operand.hbm [shape: f32[2,8,256], index: 0, kind: input, shape index: {}]   ;;  %s836_s1 = inlined_call_operand.vmem [shape: f32[8,2], index: 1, kind: input, shape index: {}]   ;;  %s837_s2 = inlined_call_operand.vmem [shape: f32[2,8], index: 2, kind: input, shape index: {}]   ;;  %s838_s3 = inlined_call_operand.hbm [shape: f32[2,8,256], index: 3, kind: output, shape index: {}]  }
   0x1   :  { %10 = vsyncpa [#allocation3 + $0x1], 0 }
   0x2   :  { %11 = vsyncpa [#allocation4], 0 }
   0x3   :  { %13 = vsyncpa [#allocation4 + $0x1], 0  ;;  %s664_s12 = smov 0   ;;  %s666_s13 = smov 0  }
   0x4   :  { %s668_s14 = smov 0   ;;  %s670_s15 = smov 0  }
   0x5 LB: > { %s685_s16 = sadd.s32 4294967295, %s638_s15   ;;  %s456_s17 = sadd.s32 4294967294, %s638_s15   ;;  %s638_s15 = sphi %s670_s15, %s853_s15   ;;  %s634_s14 = sphi %s668_s14, %s852_s14   ;;  %s630_s13 = sphi %s666_s13, %s851_s13   ;;  %s626_s12 = sphi %s664_s12, %s850_s12  }
   0x6   : > { %s689_s18 = sadd.s32 1, %s638_s15   ;;  %s26_s19 = sadd.s32 1, %s634_s14 }
   0x7   : > { %s23_s20 = ssub.s32 %s638_s15, %s689_s18  ;;  %p33_p0 = scmp.ne.s32.totalorder %s634_s14, %s630_s13 }
   0x8   : > { %p24_p1 = scmp.eq.s32.totalorder %s23_s20, 0  ;;  %p34_p2 = scmp.eq.s32.totalorder %s638_s15, 0 }
   0x9   : > { %p39_p3 = scmp.ne.s32.totalorder %s630_s13, %s626_s12  ;;  %p40_p4 = scmp.eq.s32.totalorder %s685_s16, 0 }
   0xa   : > { %s701_s21 = scalar_select %p24_p1, %s634_s14, %s26_s19  }
   0xb   : > { %p703_p5 = por %p34_p2, %p33_p0  ;;  %p707_p6 = por %p40_p4, %p39_p3 }
   0xc   : > { %p105_p7 = scmp.eq.s32.totalorder %s685_s16, 1  ;;  %p111_p8 = scmp.eq.s32.totalorder %s456_s17, 1 }
   0xd   : > { %p502_p10 = scmp.lt.s32.totalorder %s638_s15, 2  ;;  %s137_s26 = sand.u32 1, %s634_s14  }
   0xe   : > { %p714_p11 = por %p105_p7, %p33_p0  ;;  %p718_p12 = por %p111_p8, %p39_p3 }
   0xf   : > { %s474_s27 = sshll.u32 %s638_s15, 8  ;;  %s459_s28 = sshll.u32 %s137_s26, 4 }
  0x10   : > { %s842_s24 = scalar_select %p714_p11, 1, 0 }
  0x11   : > { %s843_s25 = scalar_select %p718_p12, 1, 0 }
  0x12   : > { %s727_s4 = scalar_lea.hbm %s835_s0, %s474_s27  ;;  %s141_s5 = scalar_lea.vmem [#allocation2], %s459_s28 }
  0x13   : > { %s149_s6 = sshll.u32 %s141_s5, 4  ;;  %p731_p13 = pnand %p502_p10, %p703_p5  ;;  %s735_s6 = int_to_ptr.vmem [resolvable:$true] %s149_s6 }
  0x14   : > { %s138_s8 = scalar_lea.sflag [#allocation3], %s137_s26  ;;  %s542_s9 = scalar_lea.hbm %s727_s4, 256 }
  0x15   : > { %p543_p2 = scmp.ne.s32.totalorder %s727_s4, %s542_s9  ;;  %p544_p3 = pneg %p731_p13 }
  0x16   : > { %s547_s17 = scalar_lea.hbm %s835_s0, 512  ;;  %p548_p5 = scmp.lt.u32.totalorder %s727_s4, %s835_s0 }
  0x17   : > { %p545_p4 = pnand %p544_p3, %p543_p2  ;;  %p549_p8 = scmp.lt.u32.totalorder %s547_s17, %s542_s9 }
  0x18   : > { %p551_p9 = scmp.lt.u32.totalorder %s542_s9, %s727_s4 }
  0x19   : > { %p546_p7 = pneg %p545_p4  ;;  %p550_p10 = por %p549_p8, %p548_p5 }
  0x1b   : > { %p552_p0 = por %p551_p9, %p550_p10 }
  0x1d   : > { %p553_p1 = pnand %p552_p0, %p546_p7 }
  0x1f   : > { %556 = shalt.err (!%p553_p1)
}
  0x20   : > { %s557_s22 = scalar_lea.vmem %s735_s6, 256  ;;  %s640_s26 = smov [#allocation2]  }
  0x21   : > { %p558_p2 = scmp.ne.s32.totalorder %s735_s6, %s557_s22  ;;  %s562_s27 = sshll.u32 %s640_s26, 4  ;;  %s563_s27 = int_to_ptr.vmem [resolvable:$false] %s562_s27 }
  0x22   : > { %s564_s28 = scalar_lea.vmem %s563_s27, 512  ;;  %p565_p11 = scmp.lt.s32.totalorder %s735_s6, %s563_s27 }
  0x23   : > { %p560_p4 = pnand %p558_p2, %p544_p3  ;;  %p566_p5 = scmp.lt.s32.totalorder %s564_s28, %s557_s22 }
  0x25   : > { %p561_p12 = pneg %p560_p4  ;;  %p567_p8 = por %p566_p5, %p565_p11 }
  0x27   : > { %p568_p9 = pnand %p567_p8, %p561_p12 }
  0x29   : > { %571 = shalt.err (!%p568_p9)
}
  0x2a   : > { %497 = dma.hbm_to_vmem [thread:$0]  (!%p731_p13), %s727_s4, 256, %s735_s6, %s138_s8  }
  0x2b   : > { %p845_p0 = scmp.lt.s32.totalorder %s638_s15, 3  ;;  %p846_p1 = scmp.ge.s32.totalorder %s638_s15, 1 }
  0x2d   : > { %p155_p3 = pnand %p846_p1, %p845_p0 }
  0x2e   : > { %s769_s29 = sand.u32 (!%p155_p3), 1, %s630_s13  }
  0x2f   : > { %158 = sbr.rel (%p155_p3) target bundleno = 789 (0x315), region = 32  ;;  %s463_s30 = sshll.u32 (!%p155_p3), %s769_s29, 4 }
  0x30   : > { %s161_s5 = scalar_lea.sflag (!%p155_p3), [#allocation3], %s769_s29  ;;  %s164_s7 = scalar_lea.vmem (!%p155_p3), [#allocation2], %s463_s30 }
  0x36   : > { %617 = dma.done.wait (%p707_p6), %s161_s5, 256  }
  0x37   : > { %619 = vsyncadd (%p707_p6), %s161_s5, 4294967040  ;;  %v187_v0 = vld [vmem:[%s164_s7] sm:$0xff]  ;;  %v188_v1 = vld [vmem:[%s164_s7 + $0x8] sm:$0xff]  ;;  %v641_v3 = vmov 0.0   ;;  %vm642_vm0 = vmmov 0   ;;  %v195_v5 = vlaneseq  ;;  %vm201_vm1 = vcmask 64512  }
  0x38   : > { %v189_v2 = vadd.f32 %v188_v1, %v187_v0  ;;  %480 = vmatprep.subr.mxu0 %v641_v3  ;;  %v193_v4 = vld [vmem:[%s836_s1] sm:$0xff]  ;;  %485 = vmatprep.subr.mxu1 %v641_v3  ;;  %vm280_vm2 = vcmask 1041408   ;;  %vm276_vm3 = vcmask 15360   ;;  %s475_s9 = sshll.u32 %s685_s16, 8  ;;  %s186_s10 = scalar_lea.vmem [#allocation5], %s463_s30 }
  0x39   : > { %481 = vmatpush3.msra.mxu0 %v193_v4  ;;  %482 = vmatprep.mubr.msk.f32.mxu0 %vm642_vm0, %v641_v3  ;;  %v196_v6 = vand.u32 127, %v195_v5  ;;  %v198_v7 = vshrl.u32 %v195_v5, 7  ;;  %v275_v12 = vld [vmem:[%s837_s2] sm:$0x3]  ;;  %s386_s11 = sshll.u32 %s186_s10, 4  ;;  %s791_s20 = scalar_lea.hbm %s838_s3, %s475_s9  ;;  %s793_s11 = int_to_ptr.vmem [resolvable:$true] %s386_s11 }
  0x3a   : > { %190 = vadd.xlane.f32.xlu0 %v189_v2  ;;  %487 = vmatprep.mubr.msk.f32.mxu1 %vm642_vm0, %v641_v3  ;;  %s372_s22 = scalar_lea.sflag [#allocation4], %s769_s29  ;;  %s572_s16 = scalar_lea.vmem %s793_s11, 256 }
  0x3b   : > { %v199_v8 = vsub.s32 %v196_v6, %v198_v7  ;;  %486 = vmatpush3.msk.msra.mxu1 %vm280_vm2, %v275_v12  ;;  %v362_v21 = vsub.s32 0, %v198_v7  ;;  %p573_p6 = scmp.ne.s32.totalorder %s793_s11, %s572_s16  ;;  %p847_p11 = scmp.ne.s32.totalorder %s842_s24, 0 }
  0x3c   : > { %s643_s26 = smov [#allocation5]  }
  0x3d   : > { %p574_p12 = pnand %p573_p6, %p847_p11  ;;  %s576_s27 = sshll.u32 %s643_s26, 4  ;;  %s577_s27 = int_to_ptr.vmem [resolvable:$false] %s576_s27 }
  0x3e   : > { %s578_s28 = scalar_lea.vmem %s577_s27, 512  ;;  %p579_p7 = scmp.lt.s32.totalorder %s793_s11, %s577_s27 }
  0x3f   : > { %p575_p13 = pneg %p574_p12  ;;  %p580_p10 = scmp.lt.s32.totalorder %s578_s28, %s572_s16 }
  0x41   : > { %p581_p2 = por %p580_p10, %p579_p7 }
  0x43   : > { %p582_p4 = pnand %p581_p2, %p575_p13 }
  0xc7   : > { %v191_v9 = vpop.xlane.xlu0 %190 }
  0xc8   : > { %v192_v10 = vmul.f32 0.00390625, %v191_v9 }
  0xca   : > { %v200_v11 = vrot.slane %v192_v10, %v199_v8 }
  0xcc   : > { %483 = vmatmul.mubr.msk.f32.vlgmr.msra.gmra.mrb[0].mxu0 %vm201_vm1, %v200_v11 }
 0x19f   : > { %v270_v13 = vpop.f32.mrb[0].mxu0 }
 0x1a0   : > { %v274_v14 = vmax.f32 %v270_v13, 0.0  ;;  %v484_v15 = vpop.f32.mrb[1].mxu0 }
 0x1a2   : > { %488 = vmatmul.mubr.msk.f32.vlgmr.msra.gmra.mrb[0].mxu1 %vm276_vm3, %v274_v14 }
 0x275   : > { %v350_v16 = vpop.f32.mrb[0].mxu1 }
 0x276   : > { %v468_v17 = vmul.f32 -1.442695, %v350_v16  ;;  %v489_v18 = vpop.f32.mrb[1].mxu1 }
 0x278   : > { %538 = vpow2.f32 %v468_v17 }
 0x282   : > { %v539_v19 = vpop.eup %538 }
 0x283   : > { %v357_v20 = vadd.f32 1.0, %v539_v19 }
 0x285   : > { %540 = vrcp.f32 %v357_v20 }
 0x28f   : > { %v541_v22 = vpop.eup %540 }
 0x290   : > { %v363_v23 = vrot.slane %v541_v22, %v362_v21 }
 0x292   : > { %365 = vbcast.lane.b32.xlu0 %v363_v23, 256 }
 0x304   : > { %v366_v24 = vpop.permute.xlu0 %365 }
 0x305   : > { %v367_v25 = vmul.f32 %v366_v24, %v187_v0  ;;  %v368_v26 = vmul.f32 %v366_v24, %v188_v1 }
 0x307   : > { %369 = vst [vmem:[%s186_s10] sm:$0xff] %v367_v25  ;;  %370 = vst [vmem:[%s186_s10 + $0x8] sm:$0xff] %v368_v26 }
 0x308   : > { %585 = shalt.err (!%p582_p4)
}
 0x309   : > { %s586_s29 = scalar_lea.hbm %s791_s20, 256  ;;  %s590_s7 = scalar_lea.hbm %s838_s3, 512 }
 0x30a   : > { %p587_p5 = scmp.ne.s32.totalorder %s791_s20, %s586_s29  ;;  %p591_p0 = scmp.lt.u32.totalorder %s791_s20, %s838_s3 }
 0x30b   : > { %p592_p1 = scmp.lt.u32.totalorder %s590_s7, %s586_s29  ;;  %p594_p6 = scmp.lt.u32.totalorder %s586_s29, %s791_s20 }
 0x30c   : > { %p588_p8 = pnand %p587_p5, %p847_p11 }
 0x30d   : > { %p593_p3 = por %p592_p1, %p591_p0 }
 0x30e   : > { %p589_p9 = pneg %p588_p8 }
 0x30f   : > { %p595_p12 = por %p594_p6, %p593_p3 }
 0x311   : > { %p596_p13 = pnand %p595_p12, %p589_p9 }
 0x313   : > { %599 = shalt.err (!%p596_p13)
}
 0x314   : > { %492 = dma.vmem_to_hbm [thread:$0]  (%p847_p11), %s793_s11, 256, %s791_s20, %s372_s22  }
 0x315 PF: > { %s398_s23 = sand.u32 1, %s626_s12   ;;  %p848_p7 = scmp.ne.s32.totalorder %s843_s25, 0 }
 0x316   : > { %p849_p10 = scmp.ge.s32.totalorder %s638_s15, 2  ;;  %s399_s8 = scalar_lea.sflag [#allocation4], %s398_s23 }
 0x318   : > { %p499_p2 = pnand %p849_p10, %p848_p7 }
 0x31a   : > { %621 = dma.done.wait (!%p499_p2), %s399_s8, 256  }
 0x31b   : > { %623 = vsyncadd (!%p499_p2), %s399_s8, 4294967040  ;;  %p16_p4 = scmp.ge.s32.totalorder %s689_s18, 4   ;;  %s850_s12 = smov %s630_s13 }
 0x31c   : > { %s851_s13 = smov %s634_s14  ;;  %s852_s14 = smov %s701_s21 }
 0x31d   : > { %s853_s15 = smov %s689_s18  ;;  %18 = sbr.rel (!%p16_p4) target bundleno = 5 (0x5), region = 77 }
 0x324   :  { %404 = vsyncpa [#allocation3], 1 }
 0x325   :  { %406 = vsyncpa [#allocation3 + $0x1], 1 }
 0x326   :  { %407 = vsyncpa [#allocation4], 1 }
 0x327   :  { %409 = vsyncpa [#allocation4 + $0x1], 1 }

</bundles_post_ra>
